<compile_context>
chip_gen: v7x
topology: tpu7x:2x2x1
jax: 0.10.0
libtpu: 0.0.40
codegen_flags: <defaults>
</compile_context>

<pallas_src>
import functools

import jax
import jax.numpy as jnp
from jax.experimental import pallas as pl
from jax.experimental.pallas import tpu as pltpu


# ---------------------------------------------------------------------------
# Kernel
# ---------------------------------------------------------------------------
def actor_kernel(x_ref, w1_ref, b1_ref, w2_ref, b2_ref, wmu_ref, bmu_ref, o_ref):
    # x: [tb, in_dim] f32 (unpadded lanes) -> bf16 for the MXU.
    x = x_ref[...].astype(w1_ref.dtype)

    # fc1 + relu  (bf16 MXU, f32 accumulate, f32 elementwise)
    h1 = jnp.dot(x, w1_ref[...], preferred_element_type=jnp.float32)
    h1 = jnp.maximum(h1 + b1_ref[...], 0.0)

    # fc2 + relu
    h2 = jnp.dot(h1.astype(w2_ref.dtype), w2_ref[...],
                 preferred_element_type=jnp.float32)
    h2 = jnp.maximum(h2 + b2_ref[...], 0.0)

    # mu + tanh
    a = jnp.dot(h2.astype(wmu_ref.dtype), wmu_ref[...],
                preferred_element_type=jnp.float32)
    o_ref[...] = jnp.tanh(a + bmu_ref[...]).astype(o_ref.dtype)  # bf16 writeback


# ---------------------------------------------------------------------------
# Parameter preparation (done once, outside the jitted forward)
# ---------------------------------------------------------------------------
def _round_up(x, m):
    return ((x + m - 1) // m) * m


def prepare_params(params, compute_dtype=jnp.bfloat16):
    """Zero-pad hidden/output feature dims to multiples of 128 and cast matmul
    operands to the MXU compute dtype.  Biases stay float32.  Returns a dict
    of arrays only (safe to pass as a jit argument)."""
    in_dim, f1 = params["w1"].shape
    _, f2 = params["w2"].shape
    _, na = params["wmu"].shape
    f1_p, f2_p, na_p = _round_up(f1, 128), _round_up(f2, 128), _round_up(na, 128)

    def pad_w(w, rows, cols):
        fi, fo = w.shape
        return jnp.pad(w, ((0, rows - fi), (0, cols - fo))).astype(compute_dtype)

    def pad_b(b, cols):
        fo = b.shape[-1]
        return jnp.pad(b.reshape(1, fo), ((0, 0), (0, cols - fo))).astype(jnp.float32)

    return {
        # w1 keeps its true input dim (K=in_dim matmul; Mosaic pads registers)
        "w1": pad_w(params["w1"], in_dim, f1_p), "b1": pad_b(params["b1"], f1_p),
        "w2": pad_w(params["w2"], f1_p, f2_p),   "b2": pad_b(params["b2"], f2_p),
        "wmu": pad_w(params["wmu"], f2_p, na_p), "bmu": pad_b(params["bmu"], na_p),
    }


# ---------------------------------------------------------------------------
# Forward wrapper
# ---------------------------------------------------------------------------
@functools.partial(jax.jit, static_argnames=("n_actions", "tb_max"))
def actor_forward(state, prepared, *, n_actions, tb_max=1024):
    """state: [B, input_dim] float32.  prepared: output of prepare_params."""
    w1, b1 = prepared["w1"], prepared["b1"]      # [in_dim, f1_p], [1, f1_p]
    w2, b2 = prepared["w2"], prepared["b2"]      # [f1_p,  f2_p], [1, f2_p]
    wmu, bmu = prepared["wmu"], prepared["bmu"]  # [f2_p,  na_p], [1, na_p]

    B, in_dim = state.shape
    na_p = wmu.shape[1]

    # Batch tile: multiple of 16 (bf16/f32 sublane packing), capped at tb_max.
    b16 = _round_up(B, 16)
    tb = max(16, (min(tb_max, b16) // 16) * 16)
    # Guarantee >= 2 grid steps when B allows, so the "parallel" batch axis can
    # shard tiles across both TensorCores on v7x (no-op on v5e/v6e).
    if b16 >= 32 and (b16 // tb) < 2:
        tb = max(16, _round_up(pl.cdiv(b16, 2), 16))
    b_total = _round_up(B, tb)

    # Only batch-row padding (cheap, often a no-op); no lane padding of input.
    x = state if b_total == B else jnp.pad(state, ((0, b_total - B), (0, 0)))

    grid = (b_total // tb,)

    out = pl.pallas_call(
        actor_kernel,
        out_shape=jax.ShapeDtypeStruct((b_total, na_p), jnp.bfloat16),
        grid_spec=pltpu.PrefetchScalarGridSpec(
            num_scalar_prefetch=0,
            grid=grid,
            in_specs=[
                pl.BlockSpec((tb, in_dim), lambda i: (i, 0)),   # raw f32 state tile
                pl.BlockSpec(w1.shape, lambda i: (0, 0)),       # weights resident
                pl.BlockSpec(b1.shape, lambda i: (0, 0)),
                pl.BlockSpec(w2.shape, lambda i: (0, 0)),
                pl.BlockSpec(b2.shape, lambda i: (0, 0)),
                pl.BlockSpec(wmu.shape, lambda i: (0, 0)),
                pl.BlockSpec(bmu.shape, lambda i: (0, 0)),
            ],
            out_specs=pl.BlockSpec((tb, na_p), lambda i: (i, 0)),
        ),
        compiler_params=pltpu.CompilerParams(
            dimension_semantics=("parallel",),
        ),
    )(x, w1, b1, w2, b2, wmu, bmu)

    # Slice away batch/lane padding; hand back f32 to the caller.
    return out[:B, :n_actions].astype(jnp.float32)


# ---------------------------------------------------------------------------
# Parameter init (mimics PyTorch nn.Linear default U(-1/sqrt(fan_in), +)),
# weights stored pre-transposed as [in, out].
# ---------------------------------------------------------------------------
def init_params(key, input_dim, fc1_dims, fc2_dims, n_actions):
    ks = jax.random.split(key, 6)

    def linear(kw, kb, fan_in, fan_out):
        bound = 1.0 / jnp.sqrt(fan_in)
        w = jax.random.uniform(kw, (fan_in, fan_out), jnp.float32, -bound, bound)
        b = jax.random.uniform(kb, (1, fan_out), jnp.float32, -bound, bound)
        return w, b

    w1, b1 = linear(ks[0], ks[1], input_dim, fc1_dims)
    w2, b2 = linear(ks[2], ks[3], fc1_dims, fc2_dims)
    wmu, bmu = linear(ks[4], ks[5], fc2_dims, n_actions)
    return {"w1": w1, "b1": b1, "w2": w2, "b2": b2, "wmu": wmu, "bmu": bmu}


def reference_forward(state, p):
    h1 = jnp.maximum(state @ p["w1"] + p["b1"], 0.0)
    h2 = jnp.maximum(h1 @ p["w2"] + p["b2"], 0.0)
    return jnp.tanh(h2 @ p["wmu"] + p["bmu"])


if __name__ == "__main__":
    # Shapes consistent with the module: input_dims=(16,), fc1=32, fc2=32, n_actions=4
    batch, input_dim, fc1_dims, fc2_dims, n_actions = 2, 16, 32, 32, 4

    key = jax.random.PRNGKey(0)
    k_state, k_params = jax.random.split(key)

    state = jax.random.normal(k_state, (batch, input_dim), jnp.float32)
    params = init_params(k_params, input_dim, fc1_dims, fc2_dims, n_actions)
    prepared = prepare_params(params)          # pad + cast once, reuse per call

    out = actor_forward(state, prepared, n_actions=n_actions)
    out = jax.block_until_ready(out)

    ref = reference_forward(state, params)     # f32 reference
    assert out.shape == (batch, n_actions), out.shape
    # bf16 MXU operands + bf16 output writeback -> relaxed tolerance vs f32.
    assert jnp.allclose(out, ref, atol=3e-2, rtol=3e-2), jnp.max(jnp.abs(out - ref))

    print("KERNEL_OK")
</pallas_src>

<mosaic_0001>
module attributes {stable_mosaic.version = 11 : i64} {
  func.func @actor_kernel(%arg0: i32, %arg1: memref<16x16xf32, #tpu.memory_space<vmem>>, %arg2: memref<16x128xbf16, #tpu.memory_space<vmem>>, %arg3: memref<1x128xf32, #tpu.memory_space<vmem>>, %arg4: memref<128x128xbf16, #tpu.memory_space<vmem>>, %arg5: memref<1x128xf32, #tpu.memory_space<vmem>>, %arg6: memref<128x128xbf16, #tpu.memory_space<vmem>>, %arg7: memref<1x128xf32, #tpu.memory_space<vmem>>, %arg8: memref<16x128xbf16, #tpu.memory_space<vmem>>) attributes {dimension_semantics = [#tpu.dimension_semantics<parallel>], iteration_bounds = array<i64: 1>, scalar_prefetch = 0 : i64, scratch_operands = 0 : i64, tpu.core_type = #tpu.core_type<tc>, window_params = [{transform_indices = @transform_0, window_bounds = array<i64: 16, 16>}, {pipeline_mode = #tpu.pipeline_mode<synchronous>, transform_indices = @transform_1, window_bounds = array<i64: 16, 128>}, {pipeline_mode = #tpu.pipeline_mode<synchronous>, transform_indices = @transform_2, window_bounds = array<i64: 1, 128>}, {pipeline_mode = #tpu.pipeline_mode<synchronous>, transform_indices = @transform_3, window_bounds = array<i64: 128, 128>}, {pipeline_mode = #tpu.pipeline_mode<synchronous>, transform_indices = @transform_4, window_bounds = array<i64: 1, 128>}, {pipeline_mode = #tpu.pipeline_mode<synchronous>, transform_indices = @transform_5, window_bounds = array<i64: 128, 128>}, {pipeline_mode = #tpu.pipeline_mode<synchronous>, transform_indices = @transform_6, window_bounds = array<i64: 1, 128>}, {transform_indices = @transform_7, window_bounds = array<i64: 16, 128>}]} {
    %c0 = arith.constant 0 : index
    %c0_0 = arith.constant 0 : index
    %0 = vector.load %arg1[%c0, %c0_0] : memref<16x16xf32, #tpu.memory_space<vmem>>, vector<16x16xf32>
    %1 = arith.truncf %0 : vector<16x16xf32> to vector<16x16xbf16>
    %c0_1 = arith.constant 0 : index
    %c0_2 = arith.constant 0 : index
    %2 = vector.load %arg2[%c0_1, %c0_2] : memref<16x128xbf16, #tpu.memory_space<vmem>>, vector<16x128xbf16>
    %cst = arith.constant dense<0.000000e+00> : vector<16x128xf32>
    %3 = tpu.matmul %1, %2, %cst {dimension_numbers = #tpu.dot_dimension_numbers<[1], [0], [0], [1], [0, 0, 1, 1], [], []>} : vector<16x16xbf16>, vector<16x128xbf16>, vector<16x128xf32> -> vector<16x128xf32>
    %c0_3 = arith.constant 0 : index
    %c0_4 = arith.constant 0 : index
    %4 = vector.load %arg3[%c0_3, %c0_4] : memref<1x128xf32, #tpu.memory_space<vmem>>, vector<1x128xf32>
    %5 = vector.broadcast %4 : vector<1x128xf32> to vector<16x128xf32>
    %6 = arith.addf %3, %5 : vector<16x128xf32>
    %cst_5 = arith.constant 0.000000e+00 : f32
    %7 = vector.broadcast %cst_5 : f32 to vector<16x128xf32>
    %8 = arith.maximumf %6, %7 : vector<16x128xf32>
    %9 = arith.truncf %8 : vector<16x128xf32> to vector<16x128xbf16>
    %c0_6 = arith.constant 0 : index
    %c0_7 = arith.constant 0 : index
    %10 = vector.load %arg4[%c0_6, %c0_7] : memref<128x128xbf16, #tpu.memory_space<vmem>>, vector<128x128xbf16>
    %cst_8 = arith.constant dense<0.000000e+00> : vector<16x128xf32>
    %11 = tpu.matmul %9, %10, %cst_8 {dimension_numbers = #tpu.dot_dimension_numbers<[1], [0], [0], [1], [0, 0, 1, 1], [], []>} : vector<16x128xbf16>, vector<128x128xbf16>, vector<16x128xf32> -> vector<16x128xf32>
    %c0_9 = arith.constant 0 : index
    %c0_10 = arith.constant 0 : index
    %12 = vector.load %arg5[%c0_9, %c0_10] : memref<1x128xf32, #tpu.memory_space<vmem>>, vector<1x128xf32>
    %13 = vector.broadcast %12 : vector<1x128xf32> to vector<16x128xf32>
    %14 = arith.addf %11, %13 : vector<16x128xf32>
    %cst_11 = arith.constant 0.000000e+00 : f32
    %15 = vector.broadcast %cst_11 : f32 to vector<16x128xf32>
    %16 = arith.maximumf %14, %15 : vector<16x128xf32>
    %17 = arith.truncf %16 : vector<16x128xf32> to vector<16x128xbf16>
    %c0_12 = arith.constant 0 : index
    %c0_13 = arith.constant 0 : index
    %18 = vector.load %arg6[%c0_12, %c0_13] : memref<128x128xbf16, #tpu.memory_space<vmem>>, vector<128x128xbf16>
    %cst_14 = arith.constant dense<0.000000e+00> : vector<16x128xf32>
    %19 = tpu.matmul %17, %18, %cst_14 {dimension_numbers = #tpu.dot_dimension_numbers<[1], [0], [0], [1], [0, 0, 1, 1], [], []>} : vector<16x128xbf16>, vector<128x128xbf16>, vector<16x128xf32> -> vector<16x128xf32>
    %c0_15 = arith.constant 0 : index
    %c0_16 = arith.constant 0 : index
    %20 = vector.load %arg7[%c0_15, %c0_16] : memref<1x128xf32, #tpu.memory_space<vmem>>, vector<1x128xf32>
    %21 = vector.broadcast %20 : vector<1x128xf32> to vector<16x128xf32>
    %22 = arith.addf %19, %21 : vector<16x128xf32>
    %23 = math.tanh %22 : vector<16x128xf32>
    %24 = arith.truncf %23 : vector<16x128xf32> to vector<16x128xbf16>
    %c0_17 = arith.constant 0 : index
    %c0_18 = arith.constant 0 : index
    %25 = vector.load %arg8[%c0_17, %c0_18] : memref<16x128xbf16, #tpu.memory_space<vmem>>, vector<16x128xbf16>
    tpu.vector_store %arg8[%c0_17, %c0_18], %24 {strides = array<i32>} : memref<16x128xbf16, #tpu.memory_space<vmem>>, vector<16x128xbf16>,
    return
  }
  func.func @transform_0(%arg0: i32) -> (i32, i32) {
    %c0_i32 = arith.constant 0 : i32
    %c0_i32_0 = arith.constant 0 : i32
    return %arg0, %c0_i32 : i32, i32
  }
  func.func @transform_1(%arg0: i32) -> (i32, i32) {
    %c0_i32 = arith.constant 0 : i32
    %c0_i32_0 = arith.constant 0 : i32
    %c0_i32_1 = arith.constant 0 : i32
    return %c0_i32, %c0_i32_0 : i32, i32
  }
  func.func @transform_2(%arg0: i32) -> (i32, i32) {
    %c0_i32 = arith.constant 0 : i32
    %c0_i32_0 = arith.constant 0 : i32
    %c0_i32_1 = arith.constant 0 : i32
    return %c0_i32, %c0_i32_0 : i32, i32
  }
  func.func @transform_3(%arg0: i32) -> (i32, i32) {
    %c0_i32 = arith.constant 0 : i32
    %c0_i32_0 = arith.constant 0 : i32
    %c0_i32_1 = arith.constant 0 : i32
    return %c0_i32, %c0_i32_0 : i32, i32
  }
  func.func @transform_4(%arg0: i32) -> (i32, i32) {
    %c0_i32 = arith.constant 0 : i32
    %c0_i32_0 = arith.constant 0 : i32
    %c0_i32_1 = arith.constant 0 : i32
    return %c0_i32, %c0_i32_0 : i32, i32
  }
  func.func @transform_5(%arg0: i32) -> (i32, i32) {
    %c0_i32 = arith.constant 0 : i32
    %c0_i32_0 = arith.constant 0 : i32
    %c0_i32_1 = arith.constant 0 : i32
    return %c0_i32, %c0_i32_0 : i32, i32
  }
  func.func @transform_6(%arg0: i32) -> (i32, i32) {
    %c0_i32 = arith.constant 0 : i32
    %c0_i32_0 = arith.constant 0 : i32
    %c0_i32_1 = arith.constant 0 : i32
    return %c0_i32, %c0_i32_0 : i32, i32
  }
  func.func @transform_7(%arg0: i32) -> (i32, i32) {
    %c0_i32 = arith.constant 0 : i32
    %c0_i32_0 = arith.constant 0 : i32
    return %arg0, %c0_i32 : i32, i32
  }
}

</mosaic_0001>

<bundles_post_ra>
// kernel: actor_forward.1
= control target key start
LH: loop header
LB: loop body
LE: loop exit
PB: predicated region body
PF: predicated region fallthrough
CT: control target
= control target key end

     0   :  { %12 = vsyncpa [#allocation3], 0  ;;  %s651_s0 = inlined_call_operand.vmem [shape: f32[16,16], index: 0, kind: input, shape index: {}]   ;;  %s652_s1 = inlined_call_operand.vmem [shape: bf16[16,128], index: 1, kind: input, shape index: {}]   ;;  %s653_s2 = inlined_call_operand.vmem [shape: f32[1,128], index: 2, kind: input, shape index: {}]   ;;  %s654_s3 = inlined_call_operand.hbm [shape: bf16[128,128], index: 3, kind: input, shape index: {}]   ;;  %s655_s4 = inlined_call_operand.vmem [shape: f32[1,128], index: 4, kind: input, shape index: {}]   ;;  %s656_s5 = inlined_call_operand.hbm [shape: bf16[128,128], index: 5, kind: input, shape index: {}]   ;;  %s657_s6 = inlined_call_operand.vmem [shape: f32[1,128], index: 6, kind: input, shape index: {}]   ;;  %s658_s7 = inlined_call_operand.vmem [shape: bf16[16,128], index: 7, kind: output, shape index: {}]  }
   0x1   :  { %13 = vsyncpa [#allocation5], 0  ;;  %s537_s24 = smov [#allocation2]   ;;  %s489_s28 = scalar_lea.hbm %s654_s3, 1024 }
   0x2   :  { %s25_s25 = sshll.u32 %s537_s24, 4  ;;  %p490_p0 = scmp.ne.s32.totalorder %s654_s3, %s489_s28  ;;  %s26_s25 = int_to_ptr.vmem [resolvable:$true] %s25_s25 }
   0x3   :  { %p493_p1 = scmp.lt.u32.totalorder %s489_s28, %s654_s3 }
   0x5   :  { %p495_p2 = pnand %p493_p1, %p490_p0 }
   0x7   :  { %498 = shalt.err (!%p495_p2)
}
   0x8   :  { %s499_s10 = scalar_lea.vmem %s26_s25, 1024  ;;  %p504_p4 = scmp.lt.s32.totalorder %s26_s25, %s26_s25 }
   0x9   :  { %p500_p3 = scmp.ne.s32.totalorder %s26_s25, %s499_s10  ;;  %p505_p5 = scmp.lt.s32.totalorder %s499_s10, %s499_s10 }
   0xb   :  { %p506_p6 = por %p505_p5, %p504_p4 }
   0xd   :  { %p507_p7 = pnand %p506_p6, %p500_p3 }
   0xf   :  { %510 = shalt.err (!%p507_p7)
}
  0x10   :  { %s538_s11 = smov 64   ;;  %s539_s12 = smov 4  }
  0x11   :  { %31 = dma.hbm_to_vmem [thread:$0]  %s654_s3, 1024, %s26_s25, [#allocation3], %s538_s11, %s538_s11, %s539_s12  }
  0x12   :  { %s540_s15 = smov [#allocation4]   ;;  %s511_s19 = scalar_lea.hbm %s656_s5, 1024 }
  0x13   :  { %s39_s16 = sshll.u32 %s540_s15, 4  ;;  %p512_p8 = scmp.ne.s32.totalorder %s656_s5, %s511_s19  ;;  %s40_s16 = int_to_ptr.vmem [resolvable:$true] %s39_s16 }
  0x14   :  { %p515_p9 = scmp.lt.u32.totalorder %s511_s19, %s656_s5 }
  0x16   :  { %p517_p10 = pnand %p515_p9, %p512_p8 }
  0x18   :  { %520 = shalt.err (!%p517_p10)
}
  0x19   :  { %s521_s24 = scalar_lea.vmem %s40_s16, 1024  ;;  %p526_p12 = scmp.lt.s32.totalorder %s40_s16, %s40_s16 }
  0x1a   :  { %p522_p11 = scmp.ne.s32.totalorder %s40_s16, %s521_s24  ;;  %p527_p13 = scmp.lt.s32.totalorder %s521_s24, %s521_s24 }
  0x1c   :  { %p528_p0 = por %p527_p13, %p526_p12 }
  0x1e   :  { %p529_p1 = pnand %p528_p0, %p522_p11 }
  0x20   :  { %532 = shalt.err (!%p529_p1)
}
  0x21   :  { %45 = dma.hbm_to_vmem [thread:$0]  %s656_s5, 1024, %s40_s16, [#allocation5], %s538_s11, %s538_s11, %s539_s12  }
  0x22   :  { %533 = dma.done.wait [#allocation3], 1024  }
  0x23   :  { %534 = vsyncadd [#allocation3], 4294966272 }
  0x24   :  { %535 = dma.done.wait [#allocation5], 1024  }
  0x25   :  { %536 = vsyncadd [#allocation5], 4294966272  ;;  %v541_v0 = vmov 0.0   ;;  %vm542_vm0 = vmmov 0   ;;  %v468_v1 = vld [vmem:[%s652_s1] sm:$0xff]   ;;  %v56_v3 = vld [vmem:[%s651_s0 + $0x8] sm:$0xff] }
  0x26   :  { %416 = vmatprep.subr.bf16.mxu0 %v541_v0  ;;  %418 = vmatprep.mubr.msk.bf16.mxu0 %vm542_vm0, %v541_v0  ;;  %v55_v2 = vld [vmem:[%s651_s0] sm:$0xff]  ;;  %vm73_vm1 = vcmask 130048   ;;  %v470_v6 = vld [vmem:[#allocation2 + $0x8] sm:$0xff]   ;;  %v471_v7 = vld [vmem:[#allocation2 + $0x10] sm:$0xff]  }
  0x27   :  { %422 = vmatprep.subr.bf16.mxu1 %v541_v0  ;;  %438 = vmatprep.mubr.msk.bf16.mxu1 %vm542_vm0, %v541_v0  ;;  %v57_v4 = vpack.c.bf16 %v56_v3, %v55_v2  ;;  %v469_v5 = vld [vmem:[#allocation2] sm:$0xff]   ;;  %v472_v8 = vld [vmem:[#allocation2 + $0x18] sm:$0xff]   ;;  %v474_v10 = vld [vmem:[#allocation2 + $0x28] sm:$0xff]  }
  0x28   :  { %417 = vmatpush3.bf16.msra.mxu0 %v468_v1  ;;  %423 = vmatpush3.bf16.msra.mxu1 %v469_v5  ;;  %v473_v9 = vld [vmem:[#allocation2 + $0x20] sm:$0xff]   ;;  %v475_v11 = vld [vmem:[#allocation2 + $0x30] sm:$0xff]   ;;  %v476_v12 = vld [vmem:[#allocation2 + $0x38] sm:$0xff]  }
  0x29   :  { %442 = vmatprep.subr.bf16.mxu0 %v541_v0  ;;  %424 = vmatprep.subr.bf16.mxu1 %v541_v0  ;;  %v477_v13 = vld [vmem:[#allocation4] sm:$0xff]   ;;  %v478_v14 = vld [vmem:[#allocation4 + $0x8] sm:$0xff]   ;;  %v479_v15 = vld [vmem:[#allocation4 + $0x10] sm:$0xff]  }
  0x2a   :  { %v480_v16 = vld [vmem:[#allocation4 + $0x18] sm:$0xff]   ;;  %v481_v17 = vld [vmem:[#allocation4 + $0x20] sm:$0xff]   ;;  %v482_v18 = vld [vmem:[#allocation4 + $0x28] sm:$0xff]  }
  0x2b   :  { %419 = vmatmul.mubr.msk.bf16.vlgmr.msra.gmra.mrb[0].mxu0 %vm73_vm1, %v57_v4  ;;  %v366_v19 = vld [vmem:[%s653_s2] ss:$0 sm:$0xff]  ;;  %v483_v29 = vld [vmem:[#allocation4 + $0x30] sm:$0xff]   ;;  %v484_v30 = vld [vmem:[#allocation4 + $0x38] sm:$0xff]  }
  0x2c   :  { %458 = vmatprep.mubr.msk.bf16.mxu0 %vm542_vm0, %v541_v0  ;;  %425 = vmatpush3.bf16.msra.mxu1 %v470_v6  ;;  %v369_v31 = vld [vmem:[%s655_s4] ss:$0 sm:$0xff] }
  0x2d   :  { %426 = vmatprep.subr.bf16.mxu1 %v541_v0  ;;  %443 = vmatpush3.bf16.msra.mxu0 %v477_v13  ;;  %v378_v41 = vld [vmem:[%s657_s6] ss:$0 sm:$0xff] }
  0x2e   :  { %444 = vmatprep.subr.bf16.mxu0 %v541_v0 }
  0x30   :  { %427 = vmatpush3.bf16.msra.mxu1 %v471_v7 }
  0x31   :  { %428 = vmatprep.subr.bf16.mxu1 %v541_v0  ;;  %445 = vmatpush3.bf16.msra.mxu0 %v478_v14 }
  0x32   :  { %446 = vmatprep.subr.bf16.mxu0 %v541_v0 }
  0x34   :  { %429 = vmatpush3.bf16.msra.mxu1 %v472_v8 }
  0x35   :  { %430 = vmatprep.subr.bf16.mxu1 %v541_v0  ;;  %447 = vmatpush3.bf16.msra.mxu0 %v479_v15 }
  0x36   :  { %448 = vmatprep.subr.bf16.mxu0 %v541_v0 }
  0x38   :  { %431 = vmatpush3.bf16.msra.mxu1 %v473_v9 }
  0x39   :  { %432 = vmatprep.subr.bf16.mxu1 %v541_v0  ;;  %449 = vmatpush3.bf16.msra.mxu0 %v480_v16 }
  0x3a   :  { %450 = vmatprep.subr.bf16.mxu0 %v541_v0 }
  0x3c   :  { %433 = vmatpush3.bf16.msra.mxu1 %v474_v10 }
  0x3d   :  { %434 = vmatprep.subr.bf16.mxu1 %v541_v0  ;;  %451 = vmatpush3.bf16.msra.mxu0 %v481_v17 }
  0x3e   :  { %452 = vmatprep.subr.bf16.mxu0 %v541_v0 }
  0x40   :  { %435 = vmatpush3.bf16.msra.mxu1 %v475_v11 }
  0x41   :  { %436 = vmatprep.subr.bf16.mxu1 %v541_v0  ;;  %453 = vmatpush3.bf16.msra.mxu0 %v482_v18 }
  0x42   :  { %454 = vmatprep.subr.bf16.mxu0 %v541_v0 }
  0x44   :  { %437 = vmatpush3.bf16.msra.mxu1 %v476_v12 }
  0x45   :  { %455 = vmatpush3.bf16.msra.mxu0 %v483_v29 }
  0x46   :  { %456 = vmatprep.subr.bf16.mxu0 %v541_v0 }
  0x49   :  { %457 = vmatpush3.bf16.msra.mxu0 %v484_v30 }
  0xfe   :  { %v111_v20 = vpop.f32.mrb[0].mxu0 }
  0xff   :  { %v112_v21 = vadd.f32 %v366_v19, %v111_v20  ;;  %v420_v22 = vpop.f32.mrb[1].mxu0 }
 0x100   :  { %v114_v23 = vpop.f32.mrb[2].mxu0 }
 0x101   :  { %v115_v24 = vadd.f32 %v366_v19, %v114_v23  ;;  %v421_v25 = vpop.f32.mrb[3].mxu0  ;;  %v118_v26 = vmax.f32 %v112_v21, 0.0 }
 0x103   :  { %v119_v27 = vmax.f32 %v115_v24, 0.0 }
 0x105   :  { %v120_v28 = vpack.c.bf16 %v119_v27, %v118_v26 }
 0x107   :  { %439 = vmatmul.mubr.bf16.vlgmr.msra.gmra.mrb[0].mxu1 %v120_v28 }
 0x1da   :  { %v226_v32 = vpop.f32.mrb[0].mxu1 }
 0x1db   :  { %v227_v33 = vadd.f32 %v369_v31, %v226_v32  ;;  %v440_v34 = vpop.f32.mrb[1].mxu1 }
 0x1dc   :  { %v229_v35 = vpop.f32.mrb[2].mxu1 }
 0x1dd   :  { %v230_v36 = vadd.f32 %v369_v31, %v229_v35  ;;  %v441_v37 = vpop.f32.mrb[3].mxu1  ;;  %v233_v38 = vmax.f32 %v227_v33, 0.0 }
 0x1df   :  { %v234_v39 = vmax.f32 %v230_v36, 0.0 }
 0x1e1   :  { %v235_v40 = vpack.c.bf16 %v234_v39, %v233_v38 }
 0x1e3   :  { %459 = vmatmul.mubr.bf16.vlgmr.msra.gmra.mrb[4].mxu0 %v235_v40 }
 0x2b6   :  { %v341_v42 = vpop.f32.mrb[4].mxu0 }
 0x2b7   :  { %v342_v43 = vadd.f32 %v378_v41, %v341_v42  ;;  %v460_v44 = vpop.f32.mrb[5].mxu0 }
 0x2b8   :  { %v344_v45 = vpop.f32.mrb[6].mxu0 }
 0x2b9   :  { %v345_v46 = vadd.f32 %v378_v41, %v344_v45  ;;  %v461_v47 = vpop.f32.mrb[7].mxu0  ;;  %485 = vtanh.f32 %v342_v43 }
 0x2bb   :  { %487 = vtanh.f32 %v345_v46 }
 0x2c3   :  { %v486_v48 = vpop.eup %485 }
 0x2c5   :  { %v488_v49 = vpop.eup %487 }
 0x2c6   :  { %v394_v50 = vpack.c.bf16 %v488_v49, %v486_v48 }
 0x2c8   :  { %395 = vst [vmem:[%s658_s7] sm:$0xff] %v394_v50  }
 0x2c9   :  { %364 = vsyncpa [#allocation3], 1 }
 0x2ca   :  { %365 = vsyncpa [#allocation5], 1 }

</bundles_post_ra>
